<compile_context>
chip_gen: v5e
topology: v5e:2x2
jax: 0.10.0
libtpu: 0.0.40
codegen_flags: <defaults>
</compile_context>

<pallas_src>
import functools

import jax
import jax.numpy as jnp
import numpy as np
from jax import lax
from jax.experimental import pallas as pl
from jax.experimental.pallas import tpu as pltpu


def _dropout_kernel(seed_ref, x_ref, o_ref, *, threshold_u32, scale, width):
    tile_rows = x_ref.shape[0]
    row0 = (pl.program_id(0) * tile_rows).astype(jnp.uint32)

    # Global element index of every lane in this block.
    row_idx = lax.broadcasted_iota(jnp.int32, x_ref.shape, 0).astype(jnp.uint32)
    lane_idx = lax.broadcasted_iota(jnp.int32, x_ref.shape, 1).astype(jnp.uint32)
    idx = (row0 + row_idx) * jnp.uint32(width) + lane_idx

    # Counter-based hash of (seed, element index): splitmix32-style finalizer.
    seed = seed_ref[0].astype(jnp.uint32)
    h = idx + seed * jnp.uint32(0x9E3779B9)
    h = h ^ (h >> jnp.uint32(16))
    h = h * jnp.uint32(0x7FEB352D)
    h = h ^ (h >> jnp.uint32(15))
    h = h * jnp.uint32(0x846CA68B)
    h = h ^ (h >> jnp.uint32(16))

    # Drop with probability ~= p via an integer threshold compare.
    keep = h >= jnp.uint32(threshold_u32)

    x = x_ref[...]
    o_ref[...] = jnp.where(keep, x * jnp.asarray(scale, x.dtype),
                           jnp.zeros((), x.dtype))


def mask_block(x, seed, p=0.1, training=True):
    """Pallas equivalent of MaskBlock.forward (nn.Dropout(p), inverted dropout)."""
    if (not training) or p <= 0.0:
        return x
    if p >= 1.0:
        return jnp.zeros_like(x)

    orig_shape = x.shape
    dtype = x.dtype
    flat = x.reshape(-1)
    n = flat.shape[0]

    # Widest lane-dense slab that divides n -> copy-free reshape, long unmasked
    # stores, fewer/larger DMA descriptors per step.
    width = None
    for w in (1024, 512, 256, 128):
        if n % w == 0:
            width = w
            break
    pad = 0
    if width is None:
        # TODO(synk): rare path; only the <128-element tail actually needs
        # padding, but we pad the flat array for simplicity.
        width = 128
        pad = (-n) % width
        flat = jnp.pad(flat, (0, pad))
    rows = (n + pad) // width
    x2d = flat.reshape(rows, width)

    # ~2 MiB blocks (multiple of 8 rows); ragged last block handled by the
    # cdiv grid. Small inputs use a single full-array block.
    itemsize = jnp.dtype(dtype).itemsize
    target_rows = max(8, (2 * 1024 * 1024 // (width * itemsize)) // 8 * 8)
    if rows <= target_rows:
        tile_rows = rows
        grid = (1,)
    else:
        tile_rows = target_rows
        grid = (pl.cdiv(rows, tile_rows),)

    threshold_u32 = min(int(round(float(p) * (1 << 32))), (1 << 32) - 1)
    scale = 1.0 / (1.0 - float(p))
    seed_arr = jnp.asarray([seed], dtype=jnp.int32)

    kernel = functools.partial(
        _dropout_kernel, threshold_u32=threshold_u32, scale=scale, width=width
    )

    out2d = pl.pallas_call(
        kernel,
        out_shape=jax.ShapeDtypeStruct((rows, width), dtype),
        grid=grid,
        in_specs=[
            pl.BlockSpec(memory_space=pltpu.MemorySpace.SMEM),       # seed scalar
            pl.BlockSpec((tile_rows, width), lambda i: (i, 0)),      # x tile
        ],
        out_specs=pl.BlockSpec((tile_rows, width), lambda i: (i, 0)),
        compiler_params=pltpu.CompilerParams(
            dimension_semantics=("parallel",),  # steps independent -> megacore
        ),
    )(seed_arr, x2d)

    out = out2d.reshape(-1)
    if pad:
        out = out[:n]
    return out.reshape(orig_shape)


if __name__ == "__main__":
    key = jax.random.PRNGKey(0)
    p = 0.1
    x = jax.random.normal(key, (2, 4, 16, 16), dtype=jnp.float32)

    y = jax.block_until_ready(mask_block(x, seed=1234, p=p, training=True))

    xn, yn = np.asarray(x), np.asarray(y)
    assert yn.shape == xn.shape and yn.dtype == xn.dtype
    kept = yn != 0.0
    np.testing.assert_allclose(yn[kept], xn[kept] / (1.0 - p), rtol=1e-5, atol=1e-6)
    drop_frac = 1.0 - kept.mean()
    assert 0.02 <= drop_frac <= 0.25, f"unexpected drop fraction {drop_frac}"

    # Eval mode is the identity.
    y_eval = jax.block_until_ready(mask_block(x, seed=1234, p=p, training=False))
    np.testing.assert_allclose(np.asarray(y_eval), xn)

    # Odd-sized tensor exercises the (rare) padded-tail fallback path.
    x_odd = jax.random.normal(jax.random.PRNGKey(1), (3, 5, 7), dtype=jnp.float32)
    y_odd = jax.block_until_ready(mask_block(x_odd, seed=7, p=p, training=True))
    xo, yo = np.asarray(x_odd), np.asarray(y_odd)
    ko = yo != 0.0
    np.testing.assert_allclose(yo[ko], xo[ko] / (1.0 - p), rtol=1e-5, atol=1e-6)

    print("KERNEL_OK")
</pallas_src>

<mosaic_0001>
module attributes {stable_mosaic.version = 11 : i64} {
  func.func @_dropout_kernel(%arg0: i32, %arg1: memref<1xi32, #tpu.memory_space<smem>>, %arg2: memref<2x1024xf32, #tpu.memory_space<vmem>>, %arg3: memref<2x1024xf32, #tpu.memory_space<vmem>>) attributes {dimension_semantics = [#tpu.dimension_semantics<parallel>], iteration_bounds = array<i64: 1>, scalar_prefetch = 0 : i64, scratch_operands = 0 : i64, tpu.core_type = #tpu.core_type<tc>, window_params = [{transform_indices = @transform_0, window_bounds = array<i64: 1>}, {transform_indices = @transform_1, window_bounds = array<i64: 2, 1024>}, {transform_indices = @transform_2, window_bounds = array<i64: 2, 1024>}]} {
    %c2_i32 = arith.constant 2 : i32
    %0 = arith.muli %arg0, %c2_i32 : i32
    %1 = tpu.iota {dimensions = array<i32: 0>} : vector<2x1024xi32>
    %2 = tpu.iota {dimensions = array<i32: 1>} : vector<2x1024xi32>
    %3 = vector.broadcast %0 : i32 to vector<2x1024xi32>
    %4 = arith.addi %3, %1 : vector<2x1024xi32>
    %c1024_i32 = arith.constant 1024 : i32
    %5 = vector.broadcast %c1024_i32 : i32 to vector<2x1024xi32>
    %6 = arith.muli %4, %5 : vector<2x1024xi32>
    %7 = arith.addi %6, %2 : vector<2x1024xi32>
    %c0 = arith.constant 0 : index
    %8 = memref.load %arg1[%c0] : memref<1xi32, #tpu.memory_space<smem>>
    %c-1640531527_i32 = arith.constant -1640531527 : i32
    %9 = arith.muli %8, %c-1640531527_i32 : i32
    %10 = vector.broadcast %9 : i32 to vector<2x1024xi32>
    %11 = arith.addi %7, %10 : vector<2x1024xi32>
    %c16_i32 = arith.constant 16 : i32
    %12 = vector.broadcast %c16_i32 : i32 to vector<2x1024xi32>
    %13 = arith.shrui %11, %12 : vector<2x1024xi32>
    %14 = arith.xori %11, %13 : vector<2x1024xi32>
    %c2146121005_i32 = arith.constant 2146121005 : i32
    %15 = vector.broadcast %c2146121005_i32 : i32 to vector<2x1024xi32>
    %16 = arith.muli %14, %15 : vector<2x1024xi32>
    %c15_i32 = arith.constant 15 : i32
    %17 = vector.broadcast %c15_i32 : i32 to vector<2x1024xi32>
    %18 = arith.shrui %16, %17 : vector<2x1024xi32>
    %19 = arith.xori %16, %18 : vector<2x1024xi32>
    %c-2073254261_i32 = arith.constant -2073254261 : i32
    %20 = vector.broadcast %c-2073254261_i32 : i32 to vector<2x1024xi32>
    %21 = arith.muli %19, %20 : vector<2x1024xi32>
    %c16_i32_0 = arith.constant 16 : i32
    %22 = vector.broadcast %c16_i32_0 : i32 to vector<2x1024xi32>
    %23 = arith.shrui %21, %22 : vector<2x1024xi32>
    %24 = arith.xori %21, %23 : vector<2x1024xi32>
    %c429496730_i32 = arith.constant 429496730 : i32
    %25 = vector.broadcast %c429496730_i32 : i32 to vector<2x1024xi32>
    %26 = arith.cmpi uge, %24, %25 : vector<2x1024xi32>
    %c0_1 = arith.constant 0 : index
    %c0_2 = arith.constant 0 : index
    %27 = vector.load %arg2[%c0_1, %c0_2] : memref<2x1024xf32, #tpu.memory_space<vmem>>, vector<2x1024xf32>
    %cst = arith.constant 1.11111116 : f32
    %28 = vector.broadcast %cst : f32 to vector<2x1024xf32>
    %29 = arith.mulf %27, %28 : vector<2x1024xf32>
    %cst_3 = arith.constant 0.000000e+00 : f32
    %30 = vector.broadcast %cst_3 : f32 to vector<2x1024xf32>
    %31 = arith.select %26, %29, %30 : vector<2x1024xi1>, vector<2x1024xf32>
    %c0_4 = arith.constant 0 : index
    %c0_5 = arith.constant 0 : index
    %32 = vector.load %arg3[%c0_4, %c0_5] : memref<2x1024xf32, #tpu.memory_space<vmem>>, vector<2x1024xf32>
    tpu.vector_store %arg3[%c0_4, %c0_5], %31 {strides = array<i32>} : memref<2x1024xf32, #tpu.memory_space<vmem>>, vector<2x1024xf32>,
    return
  }
  func.func @transform_0(%arg0: i32) -> i32 {
    %c0_i32 = arith.constant 0 : i32
    %c0_i32_0 = arith.constant 0 : i32
    return %c0_i32 : i32
  }
  func.func @transform_1(%arg0: i32) -> (i32, i32) {
    %c0_i32 = arith.constant 0 : i32
    %c0_i32_0 = arith.constant 0 : i32
    return %arg0, %c0_i32 : i32, i32
  }
  func.func @transform_2(%arg0: i32) -> (i32, i32) {
    %c0_i32 = arith.constant 0 : i32
    %c0_i32_0 = arith.constant 0 : i32
    return %arg0, %c0_i32 : i32, i32
  }
}

</mosaic_0001>

<bundles_post_ra>
// kernel: tpu_custom_call.1
= control target key start
LH: loop header
LB: loop body
LE: loop exit
PB: predicated region body
PF: predicated region fallthrough
CT: control target
= control target key end

     0   :  { %8 = vsyncpa [#allocation4], 0  ;;  %s332_s0 = inlined_call_operand.<no memory space> [shape: s32[1], index: 0, kind: input, shape index: {}]   ;;  %s333_s1 = inlined_call_operand.hbm [shape: f32[2,1024], index: 1, kind: input, shape index: {}]   ;;  %s334_s2 = inlined_call_operand.hbm [shape: f32[2,1024], index: 2, kind: output, shape index: {}]  }
   0x1   :  { %9 = vsyncpa [#allocation5], 0  ;;  %s17_s11 = sshll.u32 %s333_s1, 4  ;;  %s288_s12 = smov [#allocation3]   ;;  %s18_s11 = int_to_ptr.hbm [resolvable:$true] %s17_s11 }
   0x2   :  { %s19_s13 = sshll.u32 %s288_s12, 4  ;;  %s20_s13 = int_to_ptr.vmem [resolvable:$true] %s19_s13 }
   0x3   :  { %22 = dma.hbm_to_vmem [thread:$0]  %s18_s11, 256, %s20_s13, [#allocation4]  }
   0x4   :  { %284 = dma.done.wait [#allocation4], 256  }
   0x5   :  { %285 = vsyncadd [#allocation4], 4294967040  ;;  %v28_v0 = vlaneseq  ;;  %s51_s16 = smul.u32 2654435769, %s332_s0  ;;  %v149_v16 = vld [vmem:[#allocation3] sm:$0xff]  ;;  %v150_v17 = vld [vmem:[#allocation3 + $0x8] sm:$0xff] }
   0x6   :  { %v151_v22 = vmul.f32 1.1111112, %v149_v16  ;;  %v152_v23 = vmul.f32 1.1111112, %v150_v17  ;;  %vm196_vm0 = vcmask 1041408   ;;  %vm198_vm1 = vcmask 1045508  }
   0x7   :  { %v29_v1 = vshrl.u32 %v28_v0, 7  ;;  %v31_v2 = vand.u32 127, %v28_v0  ;;  %v52_v3 = vstv %s51_s16  ;;  %vm200_vm4 = vcmask 1043456   ;;  %s289_s0 = smov [#allocation6]   ;;  %s216_s19 = sshll.u32 %s334_s2, 4  ;;  %s217_s19 = int_to_ptr.hbm [resolvable:$true] %s216_s19 }
   0x8   :  { %155 = vst [vmem:[#allocation1] ss:$4 sm:$0xff] %v151_v22  ;;  %s214_s1 = sshll.u32 %s289_s0, 4  ;;  %s215_s1 = int_to_ptr.vmem [resolvable:$true] %s214_s1 }
   0x9   :  { %v32_v4 = vadd.s32 128, %v31_v2  ;;  %v33_v5 = vadd.s32 256, %v31_v2  ;;  %v34_v6 = vadd.s32 384, %v31_v2  ;;  %v41_v7 = vmul.u32 1024, %v29_v1  ;;  %157 = vst [vmem:[#allocation1 + $0x20] ss:$4 sm:$0xff] %v152_v23 }
   0xa   :  { %v35_v8 = vadd.s32 512, %v31_v2  ;;  %v36_v9 = vadd.s32 640, %v31_v2  ;;  %v37_v10 = vadd.s32 768, %v31_v2  ;;  %v38_v11 = vadd.s32 896, %v31_v2 }
   0xb   :  { %v42_v12 = vadd.s32 %v41_v7, %v31_v2  ;;  %v43_v13 = vadd.s32 %v41_v7, %v32_v4  ;;  %v44_v14 = vadd.s32 %v41_v7, %v33_v5  ;;  %v45_v15 = vadd.s32 %v41_v7, %v34_v6 }
   0xc   :  { %v46_v18 = vadd.s32 %v41_v7, %v35_v8  ;;  %v47_v19 = vadd.s32 %v41_v7, %v36_v9  ;;  %v48_v20 = vadd.s32 %v41_v7, %v37_v10  ;;  %v49_v21 = vadd.s32 %v41_v7, %v38_v11 }
   0xd   :  { %v53_v24 = vadd.s32 %v52_v3, %v42_v12  ;;  %v54_v25 = vadd.s32 %v52_v3, %v43_v13  ;;  %v55_v26 = vadd.s32 %v52_v3, %v44_v14  ;;  %v56_v27 = vadd.s32 %v52_v3, %v45_v15 }
   0xe   :  { %v57_v28 = vadd.s32 %v52_v3, %v46_v18  ;;  %v58_v29 = vadd.s32 %v52_v3, %v47_v19  ;;  %v59_v32 = vadd.s32 %v52_v3, %v48_v20  ;;  %v60_v33 = vadd.s32 %v52_v3, %v49_v21 }
   0xf   :  { %v61_v30 = vshrl.u32 %v53_v24, 16  ;;  %v62_v31 = vshrl.u32 %v54_v25, 16  ;;  %v63_v34 = vshrl.u32 %v55_v26, 16  ;;  %v64_v35 = vshrl.u32 %v56_v27, 16 }
  0x10   :  { %v65_v36 = vshrl.u32 %v57_v28, 16  ;;  %v66_v37 = vshrl.u32 %v58_v29, 16  ;;  %v67_v40 = vshrl.u32 %v59_v32, 16  ;;  %v68_v41 = vshrl.u32 %v60_v33, 16 }
  0x11   :  { %v69_v38 = vxor.u32 %v61_v30, %v53_v24  ;;  %v70_v39 = vxor.u32 %v62_v31, %v54_v25  ;;  %v71_v42 = vxor.u32 %v63_v34, %v55_v26  ;;  %v72_v43 = vxor.u32 %v64_v35, %v56_v27  ;;  %v159_v24 = vld.sshfl [vmem:[#allocation1 + $0x8] sm:$0xff pattern:$0x73625140]  ;;  %v160_v30 = vld.sshfl [vmem:[#allocation1 + $0x10] sm:$0xff pattern:$0x73625140] }
  0x12   :  { %v73_v44 = vxor.u32 %v65_v36, %v57_v28  ;;  %v74_v45 = vxor.u32 %v66_v37, %v58_v29  ;;  %v75_v48 = vxor.u32 %v67_v40, %v59_v32  ;;  %v76_v51 = vxor.u32 %v68_v41, %v60_v33  ;;  %v158_v29 = vld.sshfl [vmem:[#allocation1] sm:$0xff pattern:$0x73625140]  ;;  %v161_v35 = vld.sshfl [vmem:[#allocation1 + $0x18] sm:$0xff pattern:$0x73625140] }
  0x13   :  { %v77_v46 = vmul.u32 2146121005, %v69_v38  ;;  %v78_v47 = vmul.u32 2146121005, %v70_v39  ;;  %v79_v49 = vmul.u32 2146121005, %v71_v42 }
  0x14   :  { %v80_v50 = vmul.u32 2146121005, %v72_v43  ;;  %v81_v52 = vmul.u32 2146121005, %v73_v44  ;;  %v82_v55 = vmul.u32 2146121005, %v74_v45 }
  0x15   :  { %v85_v53 = vshrl.u32 %v77_v46, 15  ;;  %v86_v54 = vshrl.u32 %v78_v47, 15  ;;  %v83_v56 = vmul.u32 2146121005, %v75_v48  ;;  %v87_v57 = vshrl.u32 %v79_v49, 15 }
  0x16   :  { %v88_v58 = vshrl.u32 %v80_v50, 15  ;;  %v89_v59 = vshrl.u32 %v81_v52, 15  ;;  %v84_v0 = vmul.u32 2146121005, %v76_v51  ;;  %v90_v1 = vshrl.u32 %v82_v55, 15 }
  0x17   :  { %v93_v60 = vxor.u32 %v85_v53, %v77_v46  ;;  %v94_v61 = vxor.u32 %v86_v54, %v78_v47  ;;  %v95_v62 = vxor.u32 %v87_v57, %v79_v49  ;;  %v91_v4 = vshrl.u32 %v83_v56, 15  ;;  %v163_v42 = vld.sshfl [vmem:[#allocation1 + $0x28] sm:$0xff pattern:$0x73625140] }
  0x18   :  { %v96_v63 = vxor.u32 %v88_v58, %v80_v50  ;;  %v97_v5 = vxor.u32 %v89_v59, %v81_v52  ;;  %v92_v8 = vshrl.u32 %v84_v0, 15  ;;  %v98_v9 = vxor.u32 %v90_v1, %v82_v55  ;;  %v164_v47 = vld.sshfl [vmem:[#allocation1 + $0x30] sm:$0xff pattern:$0x73625140] }
  0x19   :  { %v101_v2 = vmul.u32 2221713035, %v93_v60  ;;  %v102_v3 = vmul.u32 2221713035, %v94_v61  ;;  %v103_v6 = vmul.u32 2221713035, %v95_v62  ;;  %v99_v12 = vxor.u32 %v91_v4, %v83_v56 }
  0x1a   :  { %v104_v7 = vmul.u32 2221713035, %v96_v63  ;;  %v105_v13 = vmul.u32 2221713035, %v97_v5  ;;  %v100_v16 = vxor.u32 %v92_v8, %v84_v0  ;;  %v106_v17 = vmul.u32 2221713035, %v98_v9 }
  0x1b   :  { %v109_v10 = vshrl.u32 %v101_v2, 16  ;;  %v110_v11 = vshrl.u32 %v102_v3, 16  ;;  %v111_v14 = vshrl.u32 %v103_v6, 16  ;;  %v107_v20 = vmul.u32 2221713035, %v99_v12 }
  0x1c   :  { %v112_v15 = vshrl.u32 %v104_v7, 16  ;;  %v113_v21 = vshrl.u32 %v105_v13, 16  ;;  %v108_v25 = vmul.u32 2221713035, %v100_v16  ;;  %v114_v26 = vshrl.u32 %v106_v17, 16 }
  0x1d   :  { %v117_v18 = vxor.u32 %v109_v10, %v101_v2  ;;  %v118_v19 = vxor.u32 %v110_v11, %v102_v3  ;;  %v119_v22 = vxor.u32 %v111_v14, %v103_v6  ;;  %v115_v31 = vshrl.u32 %v107_v20, 16  ;;  %v162_v52 = vld.sshfl [vmem:[#allocation1 + $0x20] sm:$0xff pattern:$0x73625140] }
  0x1e   :  { %v120_v23 = vxor.u32 %v112_v15, %v104_v7  ;;  %v121_v32 = vxor.u32 %v113_v21, %v105_v13  ;;  %v116_v36 = vshrl.u32 %v108_v25, 16  ;;  %v122_v37 = vxor.u32 %v114_v26, %v106_v17  ;;  %v165_v56 = vld.sshfl [vmem:[#allocation1 + $0x38] sm:$0xff pattern:$0x73625140] }
  0x1f   :  { %v226_v27 = vxor.u32 2147483648, %v117_v18  ;;  %v227_v28 = vxor.u32 2147483648, %v118_v19  ;;  %v228_v33 = vxor.u32 2147483648, %v119_v22  ;;  %v123_v39 = vxor.u32 %v115_v31, %v107_v20 }
  0x20   :  { %v229_v34 = vxor.u32 2147483648, %v120_v23  ;;  %v230_v41 = vxor.u32 2147483648, %v121_v32  ;;  %v124_v46 = vxor.u32 %v116_v36, %v108_v25  ;;  %v231_v51 = vxor.u32 2147483648, %v122_v37 }
  0x21   :  { %vm311_vm2 = vcmp.ge.s32.totalorder %v226_v27, 2576980378  ;;  %vm130_vm3 = vcmp.ge.s32.totalorder %v227_v28, 2576980378  ;;  %vm133_vm5 = vcmp.ge.s32.totalorder %v228_v33, 2576980378 }
  0x22   :  { %vm136_vm6 = vcmp.ge.s32.totalorder %v229_v34, 2576980378  ;;  %v175_v40 = vsel %vm130_vm3, %v159_v24, 0.0  ;;  %v176_v43 = vsel %vm133_vm5, %v160_v30, 0.0  ;;  %v174_v48 = vsel %vm311_vm2, %v158_v29, 0.0 }
  0x23   :  { %v177_v44 = vsel %vm136_vm6, %v161_v35, 0.0  ;;  %v190_v45 = vrot.slane %v175_v40, 6  ;;  %v191_v49 = vrot.slane %v176_v43, 4  ;;  %v232_v54 = vxor.u32 2147483648, %v123_v39 }
  0x24   :  { %v192_v50 = vrot.slane %v177_v44, 2  ;;  %v233_v55 = vxor.u32 2147483648, %v124_v46  ;;  %vm319_vm7 = vcmp.ge.s32.totalorder %v230_v41, 2576980378  ;;  %vm142_vm8 = vcmp.ge.s32.totalorder %v231_v51, 2576980378 }
  0x25   :  { %v197_v53 = vsel %vm196_vm0, %v174_v48, %v190_v45  ;;  %vm145_vm9 = vcmp.ge.s32.totalorder %v232_v54, 2576980378  ;;  %v179_v60 = vsel %vm142_vm8, %v163_v42, 0.0  ;;  %v178_v0 = vsel %vm319_vm7, %v162_v52, 0.0 }
  0x26   :  { %v199_v57 = vsel %vm198_vm1, %v191_v49, %v192_v50  ;;  %vm148_vm10 = vcmp.ge.s32.totalorder %v233_v55, 2576980378  ;;  %v180_v61 = vsel %vm145_vm9, %v164_v47, 0.0  ;;  %v193_v63 = vrot.slane %v179_v60, 6 }
  0x27   :  { %v201_v59 = vsel %vm200_vm4, %v197_v53, %v199_v57  ;;  %v181_v62 = vsel %vm148_vm10, %v165_v56, 0.0  ;;  %v194_v1 = vrot.slane %v180_v61, 4 }
  0x28   :  { %207 = vst [vmem:[#allocation6] sm:$0xff] %v201_v59  ;;  %v195_v2 = vrot.slane %v181_v62, 2  ;;  %v202_v3 = vsel %vm196_vm0, %v178_v0, %v193_v63 }
  0x2a   :  { %v203_v4 = vsel %vm198_vm1, %v194_v1, %v195_v2 }
  0x2b   :  { %v204_v5 = vsel %vm200_vm4, %v202_v3, %v203_v4 }
  0x2c   :  { %208 = vst [vmem:[#allocation6 + $0x8] sm:$0xff] %v204_v5 }
  0x2d   :  { %219 = dma.vmem_to_hbm [thread:$0]  %s215_s1, 256, %s217_s19, [#allocation5]  }
  0x2e   :  { %286 = dma.done.wait [#allocation5], 256  }
  0x2f   :  { %287 = vsyncadd [#allocation5], 4294967040 }
  0x30   :  { %224 = vsyncpa [#allocation4], 1 }
  0x31   :  { %225 = vsyncpa [#allocation5], 1 }

</bundles_post_ra>
